<compile_context>
chip_gen: v5e
topology: v5e:2x2
jax: 0.10.0
libtpu: 0.0.40
codegen_flags: <defaults>
</compile_context>

<pallas_src>
import functools

import jax
import jax.numpy as jnp
import numpy as np
from jax import lax
from jax.experimental import pallas as pl
from jax.experimental.pallas import tpu as pltpu


# --------------------------------------------------------------------------
# Fused kernel: per spatial tile of one image,
#   acc  = sum_taps  masked_relu( W_stack @ x_tap + bo_stack )
#   out  = acc[:C_out]                       (ReLU rows, pool scale folded in)
#   res  = acc[res_row0:res_row0+C_out] + br (linear rows)
# --------------------------------------------------------------------------
def _transition_sr_kernel(x_ref, w_ref, bo_ref, br_ref, out_ref, res_ref, *,
                          num_taps, c_out, res_row0):
    # x_ref  : (num_taps, C_in, TMS)   all pool taps of one spatial tile
    # w_ref  : (M, C_in)               stacked [wo ; zero-pad ; wr]
    # bo_ref : (M, 1)                  f32 bias, non-zero only on rows [0, C_out)
    # br_ref : (C_out, 1)              f32 residual bias
    # out/res: (1, C_out, TMS)
    w = w_ref[...]
    bo = bo_ref[...]
    rows = lax.broadcasted_iota(jnp.int32, (w.shape[0], 1), 0)
    relu_rows = rows < c_out                       # top rows: ReLU path
    acc = None
    for t in range(num_taps):                      # unrolled: num_taps is 1 or 4
        y = jnp.dot(w, x_ref[t], preferred_element_type=jnp.float32) + bo
        # per-tap ReLU; valid pre-pool because the 0.25 pool scale folded into
        # w/bo commutes with ReLU (positive homogeneity).
        y = jnp.where(relu_rows, jnp.maximum(y, 0.0), y)
        acc = y if acc is None else acc + y
    out_ref[0] = acc[:c_out].astype(out_ref.dtype)
    res_ref[0] = (acc[res_row0:res_row0 + c_out] + br_ref[...]).astype(res_ref.dtype)


# --------------------------------------------------------------------------
# Wrapper-side helpers
# --------------------------------------------------------------------------
def _bn_fold(p, eps=1e-5):
    s = p["gamma"].astype(jnp.float32) / jnp.sqrt(p["var"].astype(jnp.float32) + eps)
    b = p["beta"].astype(jnp.float32) - p["mean"].astype(jnp.float32) * s
    return s, b


def _round_up(v, m):
    return -(-v // m) * m


def _cdiv(a, b):
    return -(-a // b)


def _vmem_limit_bytes():
    """Per-generation VMEM limit (v5e/v6e: 128 MiB physical, v7x: 64 MiB)."""
    cap = 64 * 1024 * 1024                       # conservative fallback (v7x)
    try:
        info = pltpu.get_tpu_info()
        cap = int(getattr(info, "vmem_capacity_bytes", cap)) or cap
    except Exception:
        pass
    return min(cap * 3 // 4, 112 * 1024 * 1024)


def _choose_lane_tile(sp, n_imgs, num_taps, c_in, m_rows, c_out, in_isz,
                      out_isz, budget_bytes, allow_pad, max_lane_tile=None):
    """Largest lane tile TMS whose full working set fits the VMEM budget.

    Budget counts: double-buffered x block, BOTH double-buffered output
    blocks, double-buffered stacked weights/biases and the f32 accumulator."""
    per_lane = (2 * num_taps * c_in * in_isz       # x block (2 buffers)
                + 2 * 2 * c_out * out_isz          # out + res blocks (2 buffers)
                + m_rows * 4)                      # f32 accumulator
    fixed = (2 * m_rows * c_in * in_isz            # stacked weights (2 buffers)
             + 4 * (m_rows + c_out) * 4            # biases
             + 512 * 1024)                         # Mosaic internal scratch slack
    avail = max(0, budget_bytes - fixed)
    cap = (avail // per_lane) // 128 * 128
    cap = max(128, cap)
    if max_lane_tile is not None:
        cap = max(128, min(cap, (max_lane_tile // 128) * 128))

    if sp <= cap:
        if allow_pad:
            tms = _round_up(sp, 128)               # lane-dense stores; pad fuses
        else:                                      # into the existing regroup pass
            tms = sp                               # full-extent tile, no pad copy
        n_sp = 1
    else:
        n_sp = _cdiv(sp, cap)
        tms = _round_up(_cdiv(sp, n_sp), 128)      # balanced tiles, 128-multiple
        n_sp = _cdiv(sp, tms)

    # v7x megacore: ensure >= 2 grid programs when it costs nothing extra
    # (pooling path already materializes / pads the regrouped input).
    if allow_pad and n_imgs * n_sp < 2 and sp > 128:
        tms = _round_up(_cdiv(sp, 2), 128)
        n_sp = _cdiv(sp, tms)
    return tms, n_sp, n_sp * tms


def transition_sr_forward(x, params, pooling=True, compute_dtype=None,
                          max_lane_tile=None):
    """Pallas implementation of _TransitionSR.forward (returns [out, res])."""
    N, C_in, H, W = x.shape
    if compute_dtype is None:
        cdt = x.dtype if jnp.issubdtype(x.dtype, jnp.floating) else jnp.float32
    else:
        cdt = jnp.dtype(compute_dtype)
    out_dtype = x.dtype if jnp.issubdtype(x.dtype, jnp.floating) else jnp.float32

    Wc = params["conv_w"].astype(jnp.float32)      # (C_out, C_in) == weight[:, :, 0, 0]
    cb = params["conv_b"].astype(jnp.float32)
    C_out = Wc.shape[0]
    s1, b1 = _bn_fold(params["bn1"])               # SRConv.bn   (over in_planes)
    s2, b2 = _bn_fold(params["bnsc_sr"])           # SRConv.bnsc
    s3, b3 = _bn_fold(params["bnsc_tr"])           # _TransitionSR.bnsc

    pool_scale = 0.25 if pooling else 1.0

    # ReLU path: conv1x1 o bn1 (+conv bias), 1/4 pool scale folded in.
    wo = (Wc * s1[None, :]) * pool_scale                                    # (C_out, C_in)
    bo = (jnp.dot(Wc, b1, precision=lax.Precision.HIGHEST) + cb) * pool_scale

    # Residual path: channel fold (F.pad / split+sum) as a matmul with exactly
    # C_in columns (zero-padded channels contribute nothing), bnsc_sr*bnsc_tr
    # scales and the 1/4 pool scale folded in.
    num_chunks = max(1, _cdiv(C_in, C_out))
    fold = np.zeros((C_out, C_in), np.float32)
    for k in range(num_chunks):
        oc = np.arange(min(C_out, C_in - k * C_out))
        fold[oc, k * C_out + oc] = 1.0
    wr = jnp.asarray(fold) * ((s2 * s3 * pool_scale)[:, None])              # (C_out, C_in)
    br = (b2 * s3 + b3).reshape(C_out, 1)

    # Stack [wo ; zero-pad ; wr] so both paths ride one MXU matmul per tap.
    # The residual rows start at an 8-aligned row so the final slice is cheap.
    res_row0 = _round_up(C_out, 8)
    M = res_row0 + C_out
    w_stack = jnp.zeros((M, C_in), jnp.float32).at[:C_out].set(wo).at[res_row0:].set(wr)
    bo_stack = jnp.zeros((M, 1), jnp.float32).at[:C_out, 0].set(bo)

    if pooling:
        if H % 2 or W % 2:
            raise ValueError("AvgPool2d(2,2) path needs even H and W")
        Ho, Wsp, num_taps = H // 2, W // 2, 4
    else:
        Ho, Wsp, num_taps = H, W, 1
    SP = Ho * Wsp

    in_isz = jnp.dtype(cdt).itemsize
    out_isz = jnp.dtype(out_dtype).itemsize
    vmem_limit = _vmem_limit_bytes()
    budget = int(vmem_limit * 0.8)
    TMS, n_sp, SP_pad = _choose_lane_tile(
        SP, N, num_taps, C_in, M, C_out, in_isz, out_isz, budget,
        allow_pad=pooling, max_lane_tile=max_lane_tile)

    # Input regroup.
    if pooling:
        # ONE fused XLA pass over x (cast + transpose + pad) producing the
        # tap-major tensor.  TODO(synk): do the w even/odd pairing in-kernel
        # (free h-split reshape + pltpu.roll / stride-2 pl.ds) to drop it.
        xt = (x.astype(cdt)
              .reshape(N, C_in, Ho, 2, Wsp, 2)
              .transpose(0, 3, 5, 1, 2, 4)                 # (N, 2, 2, C_in, Ho, Wo)
              .reshape(N * 4, C_in, SP))
        if SP_pad != SP:
            xt = jnp.pad(xt, ((0, 0), (0, 0), (0, SP_pad - SP)))
    else:
        xt = x.astype(cdt).reshape(N, C_in, SP)            # free reshape, no copy
        if SP_pad != SP:                                   # only if multi-tile
            xt = jnp.pad(xt, ((0, 0), (0, 0), (0, SP_pad - SP)))

    kern = functools.partial(_transition_sr_kernel, num_taps=num_taps,
                             c_out=C_out, res_row0=res_row0)
    out_arr, res_arr = pl.pallas_call(
        kern,
        out_shape=(jax.ShapeDtypeStruct((N, C_out, SP_pad), out_dtype),
                   jax.ShapeDtypeStruct((N, C_out, SP_pad), out_dtype)),
        grid=(N, n_sp),
        in_specs=[
            pl.BlockSpec((num_taps, C_in, TMS), lambda n, s: (n, 0, s)),
            pl.BlockSpec((M, C_in), lambda n, s: (0, 0)),
            pl.BlockSpec((M, 1), lambda n, s: (0, 0)),
            pl.BlockSpec((C_out, 1), lambda n, s: (0, 0)),
        ],
        out_specs=(pl.BlockSpec((1, C_out, TMS), lambda n, s: (n, 0, s)),
                   pl.BlockSpec((1, C_out, TMS), lambda n, s: (n, 0, s))),
        compiler_params=pltpu.CompilerParams(
            dimension_semantics=("parallel", "parallel"),
            vmem_limit_bytes=int(vmem_limit)),
    )(xt, w_stack.astype(cdt), bo_stack, br)

    def finish(a):
        if SP_pad != SP:
            a = a[:, :, :SP]
        return a.reshape(N, C_out, Ho, Wsp)                # free: already NCHW-flat

    return [finish(out_arr), finish(res_arr)]


# --------------------------------------------------------------------------
# Pure-JAX reference (mirrors the PyTorch module in eval mode)
# --------------------------------------------------------------------------
def ref_forward(x, params, pooling=True):
    eps = 1e-5

    def bn(y, p):
        s = p["gamma"] / jnp.sqrt(p["var"] + eps)
        b = p["beta"] - p["mean"] * s
        return y * s[None, :, None, None] + b[None, :, None, None]

    Wc = params["conv_w"]
    cb = params["conv_b"]
    N, C_in, H, W = x.shape
    C_out = Wc.shape[0]

    out = jnp.einsum("nchw,oc->nohw", bn(x, params["bn1"]), Wc,
                     precision=lax.Precision.HIGHEST)
    out = jnp.maximum(out + cb[None, :, None, None], 0.0)

    num_chunks = max(1, -(-C_in // C_out))
    C_pad = num_chunks * C_out
    xp = jnp.pad(x, ((0, 0), (0, C_pad - C_in), (0, 0), (0, 0)))
    res = xp.reshape(N, num_chunks, C_out, H, W).sum(axis=1)
    res = bn(res, params["bnsc_sr"])

    if pooling:
        def pool(y):
            return y.reshape(N, -1, H // 2, 2, W // 2, 2).mean(axis=(3, 5))
        out = pool(out)
        res = bn(pool(res), params["bnsc_tr"])
    else:
        res = bn(res, params["bnsc_tr"])
    return out, res


if __name__ == "__main__":
    def bn_params(key, c):
        kg, kb, km, kv = jax.random.split(key, 4)
        return dict(
            gamma=jax.random.normal(kg, (c,), jnp.float32) * 0.1 + 1.0,
            beta=jax.random.normal(kb, (c,), jnp.float32) * 0.1,
            mean=jax.random.normal(km, (c,), jnp.float32) * 0.1,
            var=jax.random.uniform(kv, (c,), jnp.float32, minval=0.5, maxval=1.5),
        )

    def make_params(key, c_in, c_out):
        kw, kb, k1, k2, k3 = jax.random.split(key, 5)
        return {
            "conv_w": jax.random.normal(kw, (c_out, c_in), jnp.float32) * 0.2,
            "conv_b": jax.random.normal(kb, (c_out,), jnp.float32) * 0.1,
            "bn1": bn_params(k1, c_in),
            "bnsc_sr": bn_params(k2, c_out),
            "bnsc_tr": bn_params(k3, c_out),
        }

    root = jax.random.PRNGKey(0)
    # (N, C_in, C_out, H, W, pooling, max_lane_tile)
    cases = [
        (2, 16, 8, 16, 16, True, None),    # C_in > C_out: split+sum fold, pooling
        (2, 16, 8, 16, 16, False, None),   # no-pooling path (pure free reshape)
        (2, 16, 8, 36, 36, True, 128),     # multi spatial tile + padded tail
        (1, 6, 12, 8, 8, True, None),      # C_in < C_out (zero-pad fold), odd C_out
    ]
    for i, (N, C_in, C_out, H, W, pooling, mlt) in enumerate(cases):
        kx, kp = jax.random.split(jax.random.fold_in(root, i))
        x = jax.random.normal(kx, (N, C_in, H, W), jnp.float32)
        params = make_params(kp, C_in, C_out)

        fwd = jax.jit(functools.partial(transition_sr_forward,
                                        pooling=pooling, max_lane_tile=mlt))
        out, res = fwd(x, params)
        jax.block_until_ready(out)
        jax.block_until_ready(res)

        ref_out, ref_res = ref_forward(x, params, pooling=pooling)
        # Tolerance allows for differing MXU matmul precision strategies between
        # the in-kernel dot (folded scales) and the XLA reference einsum.
        np.testing.assert_allclose(np.asarray(out), np.asarray(ref_out),
                                   rtol=2e-2, atol=2e-2)
        np.testing.assert_allclose(np.asarray(res), np.asarray(ref_res),
                                   rtol=2e-2, atol=2e-2)

    print("KERNEL_OK")
</pallas_src>

<mosaic_0001>
module attributes {stable_mosaic.version = 11 : i64} {
  func.func @_transition_sr_kernel(%arg0: i32, %arg1: i32, %arg2: memref<4x16x128xf32, #tpu.memory_space<vmem>>, %arg3: memref<16x16xf32, #tpu.memory_space<vmem>>, %arg4: memref<16x1xf32, #tpu.memory_space<vmem>>, %arg5: memref<8x1xf32, #tpu.memory_space<vmem>>, %arg6: memref<1x8x128xf32, #tpu.memory_space<vmem>>, %arg7: memref<1x8x128xf32, #tpu.memory_space<vmem>>) attributes {dimension_semantics = [#tpu.dimension_semantics<parallel>, #tpu.dimension_semantics<parallel>], iteration_bounds = array<i64: 2, 1>, scalar_prefetch = 0 : i64, scratch_operands = 0 : i64, tpu.core_type = #tpu.core_type<tc>, window_params = [{transform_indices = @transform_0, window_bounds = array<i64: 4, 16, 128>}, {pipeline_mode = #tpu.pipeline_mode<synchronous>, transform_indices = @transform_1, window_bounds = array<i64: 16, 16>}, {pipeline_mode = #tpu.pipeline_mode<synchronous>, transform_indices = @transform_2, window_bounds = array<i64: 16, 1>}, {pipeline_mode = #tpu.pipeline_mode<synchronous>, transform_indices = @transform_3, window_bounds = array<i64: 8, 1>}, {transform_indices = @transform_4, window_bounds = array<i64: 1, 8, 128>}, {transform_indices = @transform_5, window_bounds = array<i64: 1, 8, 128>}]} {
    %c0 = arith.constant 0 : index
    %c0_0 = arith.constant 0 : index
    %0 = vector.load %arg3[%c0, %c0_0] : memref<16x16xf32, #tpu.memory_space<vmem>>, vector<16x16xf32>
    %c0_1 = arith.constant 0 : index
    %c0_2 = arith.constant 0 : index
    %1 = vector.load %arg4[%c0_1, %c0_2] : memref<16x1xf32, #tpu.memory_space<vmem>>, vector<16x1xf32>
    %2 = tpu.iota {dimensions = array<i32: 0>} : vector<16x1xi32>
    %c8_i32 = arith.constant 8 : i32
    %3 = vector.broadcast %c8_i32 : i32 to vector<16x1xi32>
    %4 = arith.cmpi slt, %2, %3 : vector<16x1xi32>
    %c0_3 = arith.constant 0 : index
    %c0_4 = arith.constant 0 : index
    %c0_5 = arith.constant 0 : index
    %5 = vector.load %arg2[%c0_3, %c0_4, %c0_5] : memref<4x16x128xf32, #tpu.memory_space<vmem>>, vector<1x16x128xf32>
    %6 = vector.shape_cast %5 : vector<1x16x128xf32> to vector<16x128xf32>
    %cst = arith.constant dense<0.000000e+00> : vector<16x128xf32>
    %7 = tpu.matmul %0, %6, %cst {dimension_numbers = #tpu.dot_dimension_numbers<[1], [0], [0], [1], [0, 0, 1, 1], [], []>} : vector<16x16xf32>, vector<16x128xf32>, vector<16x128xf32> -> vector<16x128xf32>
    %8 = vector.broadcast %1 : vector<16x1xf32> to vector<16x128xf32>
    %9 = arith.addf %7, %8 : vector<16x128xf32>
    %cst_6 = arith.constant 0.000000e+00 : f32
    %10 = vector.broadcast %cst_6 : f32 to vector<16x128xf32>
    %11 = arith.maximumf %9, %10 : vector<16x128xf32>
    %12 = vector.shape_cast %4 : vector<16x1xi1> to vector<16x1xi1>
    %13 = vector.broadcast %12 : vector<16x1xi1> to vector<16x128xi1>
    %14 = arith.select %13, %11, %9 : vector<16x128xi1>, vector<16x128xf32>
    %c1 = arith.constant 1 : index
    %c0_7 = arith.constant 0 : index
    %c0_8 = arith.constant 0 : index
    %15 = vector.load %arg2[%c1, %c0_7, %c0_8] : memref<4x16x128xf32, #tpu.memory_space<vmem>>, vector<1x16x128xf32>
    %16 = vector.shape_cast %15 : vector<1x16x128xf32> to vector<16x128xf32>
    %cst_9 = arith.constant dense<0.000000e+00> : vector<16x128xf32>
    %17 = tpu.matmul %0, %16, %cst_9 {dimension_numbers = #tpu.dot_dimension_numbers<[1], [0], [0], [1], [0, 0, 1, 1], [], []>} : vector<16x16xf32>, vector<16x128xf32>, vector<16x128xf32> -> vector<16x128xf32>
    %18 = vector.broadcast %1 : vector<16x1xf32> to vector<16x128xf32>
    %19 = arith.addf %17, %18 : vector<16x128xf32>
    %cst_10 = arith.constant 0.000000e+00 : f32
    %20 = vector.broadcast %cst_10 : f32 to vector<16x128xf32>
    %21 = arith.maximumf %19, %20 : vector<16x128xf32>
    %22 = vector.shape_cast %4 : vector<16x1xi1> to vector<16x1xi1>
    %23 = vector.broadcast %22 : vector<16x1xi1> to vector<16x128xi1>
    %24 = arith.select %23, %21, %19 : vector<16x128xi1>, vector<16x128xf32>
    %25 = arith.addf %14, %24 : vector<16x128xf32>
    %c2 = arith.constant 2 : index
    %c0_11 = arith.constant 0 : index
    %c0_12 = arith.constant 0 : index
    %26 = vector.load %arg2[%c2, %c0_11, %c0_12] : memref<4x16x128xf32, #tpu.memory_space<vmem>>, vector<1x16x128xf32>
    %27 = vector.shape_cast %26 : vector<1x16x128xf32> to vector<16x128xf32>
    %cst_13 = arith.constant dense<0.000000e+00> : vector<16x128xf32>
    %28 = tpu.matmul %0, %27, %cst_13 {dimension_numbers = #tpu.dot_dimension_numbers<[1], [0], [0], [1], [0, 0, 1, 1], [], []>} : vector<16x16xf32>, vector<16x128xf32>, vector<16x128xf32> -> vector<16x128xf32>
    %29 = vector.broadcast %1 : vector<16x1xf32> to vector<16x128xf32>
    %30 = arith.addf %28, %29 : vector<16x128xf32>
    %cst_14 = arith.constant 0.000000e+00 : f32
    %31 = vector.broadcast %cst_14 : f32 to vector<16x128xf32>
    %32 = arith.maximumf %30, %31 : vector<16x128xf32>
    %33 = vector.shape_cast %4 : vector<16x1xi1> to vector<16x1xi1>
    %34 = vector.broadcast %33 : vector<16x1xi1> to vector<16x128xi1>
    %35 = arith.select %34, %32, %30 : vector<16x128xi1>, vector<16x128xf32>
    %36 = arith.addf %25, %35 : vector<16x128xf32>
    %c3 = arith.constant 3 : index
    %c0_15 = arith.constant 0 : index
    %c0_16 = arith.constant 0 : index
    %37 = vector.load %arg2[%c3, %c0_15, %c0_16] : memref<4x16x128xf32, #tpu.memory_space<vmem>>, vector<1x16x128xf32>
    %38 = vector.shape_cast %37 : vector<1x16x128xf32> to vector<16x128xf32>
    %cst_17 = arith.constant dense<0.000000e+00> : vector<16x128xf32>
    %39 = tpu.matmul %0, %38, %cst_17 {dimension_numbers = #tpu.dot_dimension_numbers<[1], [0], [0], [1], [0, 0, 1, 1], [], []>} : vector<16x16xf32>, vector<16x128xf32>, vector<16x128xf32> -> vector<16x128xf32>
    %40 = vector.broadcast %1 : vector<16x1xf32> to vector<16x128xf32>
    %41 = arith.addf %39, %40 : vector<16x128xf32>
    %cst_18 = arith.constant 0.000000e+00 : f32
    %42 = vector.broadcast %cst_18 : f32 to vector<16x128xf32>
    %43 = arith.maximumf %41, %42 : vector<16x128xf32>
    %44 = vector.shape_cast %4 : vector<16x1xi1> to vector<16x1xi1>
    %45 = vector.broadcast %44 : vector<16x1xi1> to vector<16x128xi1>
    %46 = arith.select %45, %43, %41 : vector<16x128xi1>, vector<16x128xf32>
    %47 = arith.addf %36, %46 : vector<16x128xf32>
    %48 = vector.extract_strided_slice %47 {offsets = [0, 0], sizes = [8, 128], strides = [1, 1]} : vector<16x128xf32> to vector<8x128xf32>
    %c0_19 = arith.constant 0 : index
    %c0_20 = arith.constant 0 : index
    %c0_21 = arith.constant 0 : index
    %49 = vector.load %arg6[%c0_19, %c0_20, %c0_21] : memref<1x8x128xf32, #tpu.memory_space<vmem>>, vector<1x8x128xf32>
    %50 = vector.shape_cast %49 : vector<1x8x128xf32> to vector<8x128xf32>
    %51 = vector.shape_cast %48 : vector<8x128xf32> to vector<1x8x128xf32>
    tpu.vector_store %arg6[%c0_19, %c0_20, %c0_21], %51 {strides = array<i32>} : memref<1x8x128xf32, #tpu.memory_space<vmem>>, vector<1x8x128xf32>,
    %52 = vector.extract_strided_slice %47 {offsets = [8, 0], sizes = [8, 128], strides = [1, 1]} : vector<16x128xf32> to vector<8x128xf32>
    %c0_22 = arith.constant 0 : index
    %c0_23 = arith.constant 0 : index
    %53 = vector.load %arg5[%c0_22, %c0_23] : memref<8x1xf32, #tpu.memory_space<vmem>>, vector<8x1xf32>
    %54 = vector.broadcast %53 : vector<8x1xf32> to vector<8x128xf32>
    %55 = arith.addf %52, %54 : vector<8x128xf32>
    %c0_24 = arith.constant 0 : index
    %c0_25 = arith.constant 0 : index
    %c0_26 = arith.constant 0 : index
    %56 = vector.load %arg7[%c0_24, %c0_25, %c0_26] : memref<1x8x128xf32, #tpu.memory_space<vmem>>, vector<1x8x128xf32>
    %57 = vector.shape_cast %56 : vector<1x8x128xf32> to vector<8x128xf32>
    %58 = vector.shape_cast %55 : vector<8x128xf32> to vector<1x8x128xf32>
    tpu.vector_store %arg7[%c0_24, %c0_25, %c0_26], %58 {strides = array<i32>} : memref<1x8x128xf32, #tpu.memory_space<vmem>>, vector<1x8x128xf32>,
    return
  }
  func.func @transform_0(%arg0: i32, %arg1: i32) -> (i32, i32, i32) {
    %c0_i32 = arith.constant 0 : i32
    %c0_i32_0 = arith.constant 0 : i32
    return %arg0, %c0_i32, %arg1 : i32, i32, i32
  }
  func.func @transform_1(%arg0: i32, %arg1: i32) -> (i32, i32) {
    %c0_i32 = arith.constant 0 : i32
    %c0_i32_0 = arith.constant 0 : i32
    %c0_i32_1 = arith.constant 0 : i32
    return %c0_i32, %c0_i32_0 : i32, i32
  }
  func.func @transform_2(%arg0: i32, %arg1: i32) -> (i32, i32) {
    %c0_i32 = arith.constant 0 : i32
    %c0_i32_0 = arith.constant 0 : i32
    %c0_i32_1 = arith.constant 0 : i32
    return %c0_i32, %c0_i32_0 : i32, i32
  }
  func.func @transform_3(%arg0: i32, %arg1: i32) -> (i32, i32) {
    %c0_i32 = arith.constant 0 : i32
    %c0_i32_0 = arith.constant 0 : i32
    %c0_i32_1 = arith.constant 0 : i32
    return %c0_i32, %c0_i32_0 : i32, i32
  }
  func.func @transform_4(%arg0: i32, %arg1: i32) -> (i32, i32, i32) {
    %c0_i32 = arith.constant 0 : i32
    %c0_i32_0 = arith.constant 0 : i32
    return %arg0, %c0_i32, %arg1 : i32, i32, i32
  }
  func.func @transform_5(%arg0: i32, %arg1: i32) -> (i32, i32, i32) {
    %c0_i32 = arith.constant 0 : i32
    %c0_i32_0 = arith.constant 0 : i32
    return %arg0, %c0_i32, %arg1 : i32, i32, i32
  }
}

</mosaic_0001>

<bundles_post_ra>
// kernel: transition_sr_forward.1
= control target key start
LH: loop header
LB: loop body
LE: loop exit
PB: predicated region body
PF: predicated region fallthrough
CT: control target
= control target key end

     0   :  { %s669_s18 = smov 0   ;;  %s671_s19 = smov 0   ;;  %s725_s0 = inlined_call_operand.vmem [shape: f32[8,16,128], index: 0, kind: input, shape index: {}]   ;;  %s726_s1 = inlined_call_operand.vmem [shape: f32[16,16], index: 1, kind: input, shape index: {}]   ;;  %s727_s2 = inlined_call_operand.vmem [shape: f32[16,1], index: 2, kind: input, shape index: {}]   ;;  %s728_s3 = inlined_call_operand.vmem [shape: f32[8,1], index: 3, kind: input, shape index: {}]   ;;  %s729_s4 = inlined_call_operand.vmem [shape: f32[2,8,128], index: 4, kind: output, shape index: {0}]   ;;  %s730_s5 = inlined_call_operand.vmem [shape: f32[2,8,128], index: 5, kind: output, shape index: {1}]  }
   0x1   :  { %s673_s20 = smov 0  }
   0x2 LB: > { %s28_s21 = sadd.s32 1, %s632_s19  ;;  %p564_p0 = scmp.ge.s32.totalorder %s636_s20, 1  ;;  %s636_s20 = sphi %s673_s20, %s16_s20   ;;  %s632_s19 = sphi %s671_s19, %s732_s19   ;;  %s628_s18 = sphi %s669_s18, %s731_s18  }
   0x3   : > { %p30_p1 = scmp.ge.s32.totalorder %s28_s21, 2  ;;  %p213_p2 = scmp.lt.s32.totalorder %s636_s20, 3 }
   0x5   : > { %s734_s21 = smov (%p30_p1, %s28_s21), 0  ;;  %p214_p3 = pnand %p564_p0, %p213_p2 }
   0x6   : > { %s565_s22 = sshll.u32 (!%p214_p3), %s628_s18, 2  ;;  %p264_p5 = scmp.lt.s32.totalorder (!%p214_p3), %s628_s18, 1 }
   0x7   : > { %217 = sbr.rel (%p214_p3) target bundleno = 170 (0xaa), region = 36  ;;  %p255_p4 = scmp.lt.s32.totalorder (!%p214_p3), %s565_s22, 7 }
   0xc   : > { %v280_v0 = vld [vmem:[%s727_s2] sm:$0xff]  ;;  %v638_v1 = vmov 0   ;;  %s736_s22 = smov (!%p255_p4, %s565_s22), 7  ;;  %vm299_vm0 = vcmask 130048   ;;  %v281_v12 = vld [vmem:[%s727_s2 + $0x8] sm:$0xff]  ;;  %s738_s18 = smov (!%p264_p5, %s628_s18), 1 }
   0xd   : > { %612 = vset.pattern.permute.xlu0 %v638_v1  ;;  %613 = vset.pattern.permute.xlu1 %v638_v1  ;;  %v434_v2 = vld [vmem:[%s728_s3] sm:$0xff]  ;;  %s586_s27 = sshll.u32 %s736_s22, 4  ;;  %v279_v13 = vld [vmem:[%s726_s1 + $0x8] sm:$0xff]  ;;  %s568_s12 = sshll.u32 %s738_s18, 3 }
   0xe   : > { %291 = vperm.xlu0 %612, %v280_v0   ;;  %437 = vperm.xlu1 %613, %v434_v2   ;;  %s262_s30 = scalar_lea.vmem %s725_s0, %s586_s27  ;;  %v278_v11 = vld [vmem:[%s726_s1] sm:$0xff]  ;;  %s270_s15 = scalar_lea.vmem %s729_s4, %s568_s12 }
   0xf   : > { %v288_v3 = vld [vmem:[%s262_s30 + $0x8] sm:$0xff]  ;;  %v573_v4 = vld [vmem:[%s262_s30 + $0x18] sm:$0xff]  ;;  %v287_v7 = vld [vmem:[%s262_s30] sm:$0xff]  ;;  %s277_s18 = scalar_lea.vmem %s730_s5, %s568_s12 }
  0x10   : > { %v577_v5 = vld [vmem:[%s262_s30 + $0x28] sm:$0xff]  ;;  %320 = vmatpush.msra.mxu0 %v288_v3  ;;  %354 = vmatpush.msra.mxu1 %v573_v4  ;;  %v581_v6 = vld [vmem:[%s262_s30 + $0x38] sm:$0xff]  ;;  %v572_v8 = vld [vmem:[%s262_s30 + $0x10] sm:$0xff] }
  0x11   : > { %386 = vmatpush.msra.mxu2 %v577_v5  ;;  %418 = vmatpush.msra.mxu3 %v581_v6  ;;  %v576_v9 = vld [vmem:[%s262_s30 + $0x20] sm:$0xff]  ;;  %v580_v10 = vld [vmem:[%s262_s30 + $0x30] sm:$0xff] }
  0x12   : > { %321 = vmatpush.msra.mxu0 %v287_v7  ;;  %355 = vmatpush.msra.mxu1 %v572_v8 }
  0x13   : > { %387 = vmatpush.msra.mxu2 %v576_v9  ;;  %419 = vmatpush.msra.mxu3 %v580_v10 }
  0x14   : > { %570 = vmatmul.msk.f32.vlgmr.msra.gmra.mxu0 %vm299_vm0, %v278_v11  ;;  %574 = vmatmul.msk.f32.vlgmr.msra.gmra.mxu1 %vm299_vm0, %v278_v11 }
  0x15   : > { %578 = vmatmul.msk.f32.vlgmr.msra.gmra.mxu2 %vm299_vm0, %v278_v11  ;;  %582 = vmatmul.msk.f32.vlgmr.msra.gmra.mxu3 %vm299_vm0, %v278_v11 }
  0x16   : > { %296 = vperm.xlu0 %612, %v281_v12  }
  0x1c   : > { %571 = vmatmul.msk.f32.gmra.mxu0 %vm299_vm0, %v279_v13  ;;  %575 = vmatmul.msk.f32.gmra.mxu1 %vm299_vm0, %v279_v13 }
  0x1d   : > { %579 = vmatmul.msk.f32.gmra.mxu2 %vm299_vm0, %v279_v13  ;;  %583 = vmatmul.msk.f32.gmra.mxu3 %vm299_vm0, %v279_v13 }
  0x80   : > { %v292_v14 = vpop.permute.xlu0 %291  ;;  %v438_v41 = vpop.permute.xlu1 %437 }
  0x88   : > { %v297_v29 = vpop.permute.xlu0 %296 }
  0x91   : > { %v323_v15 = vpop.f32.mrf.mxu0  ;;  %v357_v16 = vpop.f32.mrf.mxu1 }
  0x92   : > { %v324_v17 = vadd.f32 %v323_v15, %v292_v14  ;;  %v358_v18 = vadd.f32 %v357_v16, %v292_v14 }
  0x94   : > { %v329_v19 = vmax.f32 %v324_v17, 0.0  ;;  %v363_v20 = vmax.f32 %v358_v18, 0.0 }
  0x96   : > { %v367_v23 = vadd.f32 %v363_v20, %v329_v19 }
  0x98   : > { %v389_v21 = vpop.f32.mrf.mxu2  ;;  %v421_v22 = vpop.f32.mrf.mxu3 }
  0x99   : > { %v390_v24 = vadd.f32 %v389_v21, %v292_v14  ;;  %v422_v25 = vadd.f32 %v421_v22, %v292_v14  ;;  %v326_v26 = vpop.f32.mrf.mxu0  ;;  %v360_v27 = vpop.f32.mrf.mxu1 }
  0x9a   : > { %v327_v32 = vadd.f32 %v326_v26, %v297_v29  ;;  %v361_v33 = vadd.f32 %v360_v27, %v297_v29 }
  0x9b   : > { %v395_v28 = vmax.f32 %v390_v24, 0.0  ;;  %v427_v31 = vmax.f32 %v422_v25, 0.0 }
  0x9c   : > { %v368_v37 = vadd.f32 %v361_v33, %v327_v32 }
  0x9d   : > { %v399_v30 = vadd.f32 %v395_v28, %v367_v23 }
  0x9f   : > { %v431_v34 = vadd.f32 %v427_v31, %v399_v30 }
  0xa0   : > { %v392_v35 = vpop.f32.mrf.mxu2  ;;  %v424_v36 = vpop.f32.mrf.mxu3 }
  0xa1   : > { %v393_v38 = vadd.f32 %v392_v35, %v297_v29  ;;  %433 = vst [vmem:[%s270_s15] sm:$0xff] %v431_v34  ;;  %v425_v40 = vadd.f32 %v424_v36, %v297_v29 }
  0xa3   : > { %v400_v39 = vadd.f32 %v393_v38, %v368_v37 }
  0xa5   : > { %v432_v42 = vadd.f32 %v425_v40, %v400_v39 }
  0xa7   : > { %v440_v43 = vadd.f32 %v438_v41, %v432_v42 }
  0xa9   : > { %441 = vst [vmem:[%s277_s18] sm:$0xff] %v440_v43 }
  0xaa PF: > { %s16_s20 = sadd.s32 1, %s636_s20   ;;  %s731_s18 = smov %s632_s19 }
  0xab   : > { %p13_p6 = scmp.ge.s32.totalorder %s16_s20, 4   ;;  %s732_s19 = smov %s734_s21 }
  0xad   :  { %15 = sbr.rel (!%p13_p6) target bundleno = 2 (0x2), region = 81 }

</bundles_post_ra>
